<compile_context>
chip_gen: v7x
topology: tpu7x:2x2x1
jax: 0.10.0
libtpu: 0.0.40
codegen_flags: <defaults>
</compile_context>

<pallas_src>
import functools

import jax
import jax.numpy as jnp
from jax.experimental import pallas as pl
from jax.experimental.pallas import tpu as pltpu


def _round_up(n, m):
    return ((n + m - 1) // m) * m


def mlp_kernel(x_ref, w1_ref, b1_ref, w2_ref, b2_ref, out_ref):
    # fc1: (TB, Dp) @ (Dp, Hp) -> f32 accumulate on the MXU.
    h = jnp.dot(x_ref[...], w1_ref[...], preferred_element_type=jnp.float32)
    # Bias + ReLU in f32 on the VPU.
    h = jnp.maximum(h + b1_ref[...], 0.0)
    # fc2: cast h back to the matmul operand dtype, accumulate in f32.
    o = jnp.dot(h.astype(w2_ref.dtype), w2_ref[...],
                preferred_element_type=jnp.float32)
    out_ref[...] = (o + b2_ref[...]).astype(out_ref.dtype)


@functools.partial(jax.jit, static_argnames=("compute_dtype", "batch_tile"))
def mlp_forward(x, w1, b1, w2, b2, *, compute_dtype=jnp.float32,
                batch_tile=256):
    """Forward pass of fc1 -> ReLU -> fc2.

    x:  (B, D_in)   float
    w1: (D_in, H)   (already transposed to (in, out))
    b1: (1, H)
    w2: (H, C)
    b2: (1, C)
    Returns (B, C) float32 logits.
    """
    B, D = x.shape
    H = w1.shape[1]
    C = w2.shape[1]

    LANE, SUB = 128, 8
    Dp = _round_up(D, LANE)
    Hp = _round_up(H, LANE)
    Cp = _round_up(C, LANE)

    # Batch tile: multiple of 8 sublanes, capped so the working set stays
    # comfortably inside VMEM on every generation (v7x has 64 MiB per TC).
    TB = min(_round_up(B, SUB), _round_up(batch_tile, SUB))
    Bp = _round_up(B, TB)

    # Zero-pad to lane/sublane-dense shapes; padding is mathematically inert.
    xp = jnp.zeros((Bp, Dp), compute_dtype).at[:B, :D].set(
        x.astype(compute_dtype))
    w1p = jnp.zeros((Dp, Hp), compute_dtype).at[:D, :H].set(
        w1.astype(compute_dtype))
    b1p = jnp.zeros((1, Hp), jnp.float32).at[:, :H].set(
        b1.astype(jnp.float32))
    w2p = jnp.zeros((Hp, Cp), compute_dtype).at[:H, :C].set(
        w2.astype(compute_dtype))
    b2p = jnp.zeros((1, Cp), jnp.float32).at[:, :C].set(
        b2.astype(jnp.float32))

    grid = (Bp // TB,)

    out_padded = pl.pallas_call(
        mlp_kernel,
        out_shape=jax.ShapeDtypeStruct((Bp, Cp), jnp.float32),
        grid=grid,
        in_specs=[
            # x tile marches down the batch with the grid index.
            pl.BlockSpec((TB, Dp), lambda i: (i, 0)),
            # Weights / biases: constant index -> kept VMEM-resident.
            pl.BlockSpec((Dp, Hp), lambda i: (0, 0)),
            pl.BlockSpec((1, Hp), lambda i: (0, 0)),
            pl.BlockSpec((Hp, Cp), lambda i: (0, 0)),
            pl.BlockSpec((1, Cp), lambda i: (0, 0)),
        ],
        out_specs=pl.BlockSpec((TB, Cp), lambda i: (i, 0)),
        compiler_params=pltpu.CompilerParams(
            dimension_semantics=("parallel",),
        ),
    )(xp, w1p, b1p, w2p, b2p)

    return out_padded[:B, :C]


def init_params(key, input_size, hidden_size, num_classes):
    """Deterministic init matching nn.Linear's uniform(-1/sqrt(fan_in), ...)."""
    k1, k2, k3, k4 = jax.random.split(key, 4)
    bound1 = 1.0 / jnp.sqrt(input_size)
    bound2 = 1.0 / jnp.sqrt(hidden_size)
    # Stored already transposed to (in, out) for the kernel.
    w1 = jax.random.uniform(k1, (input_size, hidden_size), jnp.float32,
                            -bound1, bound1)
    b1 = jax.random.uniform(k2, (1, hidden_size), jnp.float32,
                            -bound1, bound1)
    w2 = jax.random.uniform(k3, (hidden_size, num_classes), jnp.float32,
                            -bound2, bound2)
    b2 = jax.random.uniform(k4, (1, num_classes), jnp.float32,
                            -bound2, bound2)
    return w1, b1, w2, b2


if __name__ == "__main__":
    # Shapes consistent with the original script: batch_size=32, hidden=70.
    batch = 32
    input_size = 16
    hidden_size = 70
    num_classes = 10

    key = jax.random.PRNGKey(0)
    kx, kp = jax.random.split(key)
    x = jax.random.normal(kx, (batch, input_size), jnp.float32)
    w1, b1, w2, b2 = init_params(kp, input_size, hidden_size, num_classes)

    # Pure-JAX reference (same math as the PyTorch forward).
    ref = jnp.maximum(x @ w1 + b1, 0.0) @ w2 + b2

    # 1) f32 operands: exact semantics, tight tolerance.
    out_f32 = jax.block_until_ready(
        mlp_forward(x, w1, b1, w2, b2, compute_dtype=jnp.float32))
    assert out_f32.shape == (batch, num_classes)
    assert jnp.allclose(out_f32, ref, atol=1e-5, rtol=1e-5)

    # 2) bf16 operands with f32 accumulation: the fast path on v6e/v7x.
    out_bf16 = jax.block_until_ready(
        mlp_forward(x, w1, b1, w2, b2, compute_dtype=jnp.bfloat16))
    assert out_bf16.shape == (batch, num_classes)
    assert jnp.allclose(out_bf16, ref, atol=3e-2, rtol=3e-2)

    # 3) Multi-tile batch path (grid > 1) to exercise the pipelined loop.
    big_batch = 1024
    xb = jax.random.normal(jax.random.PRNGKey(1), (big_batch, input_size),
                           jnp.float32)
    refb = jnp.maximum(xb @ w1 + b1, 0.0) @ w2 + b2
    outb = jax.block_until_ready(
        mlp_forward(xb, w1, b1, w2, b2, compute_dtype=jnp.float32))
    assert outb.shape == (big_batch, num_classes)
    assert jnp.allclose(outb, refb, atol=1e-5, rtol=1e-5)

    print("KERNEL_OK")
</pallas_src>

<mosaic_0001>
module attributes {stable_mosaic.version = 11 : i64} {
  func.func @mlp_kernel(%arg0: i32, %arg1: memref<32x128xf32, #tpu.memory_space<vmem>>, %arg2: memref<128x128xf32, #tpu.memory_space<vmem>>, %arg3: memref<1x128xf32, #tpu.memory_space<vmem>>, %arg4: memref<128x128xf32, #tpu.memory_space<vmem>>, %arg5: memref<1x128xf32, #tpu.memory_space<vmem>>, %arg6: memref<32x128xf32, #tpu.memory_space<vmem>>) attributes {dimension_semantics = [#tpu.dimension_semantics<parallel>], iteration_bounds = array<i64: 1>, scalar_prefetch = 0 : i64, scratch_operands = 0 : i64, tpu.core_type = #tpu.core_type<tc>, window_params = [{transform_indices = @transform_0, window_bounds = array<i64: 32, 128>}, {pipeline_mode = #tpu.pipeline_mode<synchronous>, transform_indices = @transform_1, window_bounds = array<i64: 128, 128>}, {pipeline_mode = #tpu.pipeline_mode<synchronous>, transform_indices = @transform_2, window_bounds = array<i64: 1, 128>}, {pipeline_mode = #tpu.pipeline_mode<synchronous>, transform_indices = @transform_3, window_bounds = array<i64: 128, 128>}, {pipeline_mode = #tpu.pipeline_mode<synchronous>, transform_indices = @transform_4, window_bounds = array<i64: 1, 128>}, {transform_indices = @transform_5, window_bounds = array<i64: 32, 128>}]} {
    %c0 = arith.constant 0 : index
    %c0_0 = arith.constant 0 : index
    %0 = vector.load %arg1[%c0, %c0_0] : memref<32x128xf32, #tpu.memory_space<vmem>>, vector<32x128xf32>
    %c0_1 = arith.constant 0 : index
    %c0_2 = arith.constant 0 : index
    %1 = vector.load %arg2[%c0_1, %c0_2] : memref<128x128xf32, #tpu.memory_space<vmem>>, vector<128x128xf32>
    %cst = arith.constant dense<0.000000e+00> : vector<32x128xf32>
    %2 = tpu.matmul %0, %1, %cst {dimension_numbers = #tpu.dot_dimension_numbers<[1], [0], [0], [1], [0, 0, 1, 1], [], []>} : vector<32x128xf32>, vector<128x128xf32>, vector<32x128xf32> -> vector<32x128xf32>
    %c0_3 = arith.constant 0 : index
    %c0_4 = arith.constant 0 : index
    %3 = vector.load %arg3[%c0_3, %c0_4] : memref<1x128xf32, #tpu.memory_space<vmem>>, vector<1x128xf32>
    %4 = vector.broadcast %3 : vector<1x128xf32> to vector<32x128xf32>
    %5 = arith.addf %2, %4 : vector<32x128xf32>
    %cst_5 = arith.constant 0.000000e+00 : f32
    %6 = vector.broadcast %cst_5 : f32 to vector<32x128xf32>
    %7 = arith.maximumf %5, %6 : vector<32x128xf32>
    %c0_6 = arith.constant 0 : index
    %c0_7 = arith.constant 0 : index
    %8 = vector.load %arg4[%c0_6, %c0_7] : memref<128x128xf32, #tpu.memory_space<vmem>>, vector<128x128xf32>
    %cst_8 = arith.constant dense<0.000000e+00> : vector<32x128xf32>
    %9 = tpu.matmul %7, %8, %cst_8 {dimension_numbers = #tpu.dot_dimension_numbers<[1], [0], [0], [1], [0, 0, 1, 1], [], []>} : vector<32x128xf32>, vector<128x128xf32>, vector<32x128xf32> -> vector<32x128xf32>
    %c0_9 = arith.constant 0 : index
    %c0_10 = arith.constant 0 : index
    %10 = vector.load %arg5[%c0_9, %c0_10] : memref<1x128xf32, #tpu.memory_space<vmem>>, vector<1x128xf32>
    %11 = vector.broadcast %10 : vector<1x128xf32> to vector<32x128xf32>
    %12 = arith.addf %9, %11 : vector<32x128xf32>
    %c0_11 = arith.constant 0 : index
    %c0_12 = arith.constant 0 : index
    %13 = vector.load %arg6[%c0_11, %c0_12] : memref<32x128xf32, #tpu.memory_space<vmem>>, vector<32x128xf32>
    tpu.vector_store %arg6[%c0_11, %c0_12], %12 {strides = array<i32>} : memref<32x128xf32, #tpu.memory_space<vmem>>, vector<32x128xf32>,
    return
  }
  func.func @transform_0(%arg0: i32) -> (i32, i32) {
    %c0_i32 = arith.constant 0 : i32
    %c0_i32_0 = arith.constant 0 : i32
    return %arg0, %c0_i32 : i32, i32
  }
  func.func @transform_1(%arg0: i32) -> (i32, i32) {
    %c0_i32 = arith.constant 0 : i32
    %c0_i32_0 = arith.constant 0 : i32
    %c0_i32_1 = arith.constant 0 : i32
    return %c0_i32, %c0_i32_0 : i32, i32
  }
  func.func @transform_2(%arg0: i32) -> (i32, i32) {
    %c0_i32 = arith.constant 0 : i32
    %c0_i32_0 = arith.constant 0 : i32
    %c0_i32_1 = arith.constant 0 : i32
    return %c0_i32, %c0_i32_0 : i32, i32
  }
  func.func @transform_3(%arg0: i32) -> (i32, i32) {
    %c0_i32 = arith.constant 0 : i32
    %c0_i32_0 = arith.constant 0 : i32
    %c0_i32_1 = arith.constant 0 : i32
    return %c0_i32, %c0_i32_0 : i32, i32
  }
  func.func @transform_4(%arg0: i32) -> (i32, i32) {
    %c0_i32 = arith.constant 0 : i32
    %c0_i32_0 = arith.constant 0 : i32
    %c0_i32_1 = arith.constant 0 : i32
    return %c0_i32, %c0_i32_0 : i32, i32
  }
  func.func @transform_5(%arg0: i32) -> (i32, i32) {
    %c0_i32 = arith.constant 0 : i32
    %c0_i32_0 = arith.constant 0 : i32
    return %arg0, %c0_i32 : i32, i32
  }
}

</mosaic_0001>

<bundles_post_ra>
// kernel: mlp_forward.1
= control target key start
LH: loop header
LB: loop body
LE: loop exit
PB: predicated region body
PF: predicated region fallthrough
CT: control target
= control target key end

     0   :  { %s590_s1 = inlined_call_operand.vmem [shape: f32[128,128], index: 1, kind: input, shape index: {}]   ;;  %s591_s0 = inlined_call_operand.vmem [shape: f32[32,128], index: 0, kind: input, shape index: {}]   ;;  %s592_s3 = inlined_call_operand.vmem [shape: f32[128,128], index: 3, kind: input, shape index: {}]   ;;  %s593_s2 = inlined_call_operand.vmem [shape: f32[1,128], index: 2, kind: input, shape index: {}]   ;;  %s594_s4 = inlined_call_operand.vmem [shape: f32[1,128], index: 4, kind: input, shape index: {}]   ;;  %s595_s5 = inlined_call_operand.vmem [shape: f32[32,128], index: 5, kind: output, shape index: {}]  }
   0x1   :  { %v24_v0 = vld [vmem:[%s590_s1] sm:$0xff]  ;;  %v25_v1 = vld [vmem:[%s590_s1 + $0x8] sm:$0xff]  ;;  %v26_v2 = vld [vmem:[%s590_s1 + $0x10] sm:$0xff] }
   0x2   :  { %v370_v3 = vpack.c.bf16 %v25_v1, %v24_v0  ;;  %v27_v4 = vld [vmem:[%s590_s1 + $0x18] sm:$0xff]  ;;  %v28_v6 = vld [vmem:[%s590_s1 + $0x20] sm:$0xff]  ;;  %v29_v7 = vld [vmem:[%s590_s1 + $0x28] sm:$0xff] }
   0x3   :  { %v374_v5 = vpack.c.bf16 %v27_v4, %v26_v2  ;;  %v378_v8 = vpack.c.bf16 %v29_v7, %v28_v6  ;;  %v20_v9 = vld [vmem:[%s591_s0] sm:$0xff]  ;;  %v30_v10 = vld [vmem:[%s590_s1 + $0x30] sm:$0xff]  ;;  %v31_v11 = vld [vmem:[%s590_s1 + $0x38] sm:$0xff] }
   0x4   :  { %371 = vmatprep.subr.bf16.mxu0 %v370_v3  ;;  %326 = vmatprep.mubr.f32.mxu0 %v20_v9  ;;  %v136_v12 = vld [vmem:[%s592_s3] sm:$0xff]  ;;  %v137_v13 = vld [vmem:[%s592_s3 + $0x8] sm:$0xff]  ;;  %v138_v14 = vld [vmem:[%s592_s3 + $0x10] sm:$0xff]  ;;  %v382_v18 = vpack.c.bf16 %v31_v11, %v30_v10 }
   0x5   :  { %373 = vmatpush3.bf16.msra.mxu0 %v370_v3  ;;  %v139_v15 = vld [vmem:[%s592_s3 + $0x18] sm:$0xff]  ;;  %v402_v16 = vpack.c.bf16 %v137_v13, %v136_v12  ;;  %v140_v19 = vld [vmem:[%s592_s3 + $0x20] sm:$0xff]  ;;  %v141_v20 = vld [vmem:[%s592_s3 + $0x28] sm:$0xff] }
   0x6   :  { %375 = vmatprep.subr.bf16.mxu0 %v374_v5  ;;  %v406_v17 = vpack.c.bf16 %v139_v15, %v138_v14  ;;  %v32_v21 = vld [vmem:[%s590_s1 + $0x40] sm:$0xff]  ;;  %v33_v22 = vld [vmem:[%s590_s1 + $0x48] sm:$0xff]  ;;  %v410_v23 = vpack.c.bf16 %v141_v20, %v140_v19  ;;  %v142_v25 = vld [vmem:[%s592_s3 + $0x30] sm:$0xff] }
   0x7   :  { %403 = vmatprep.subr.bf16.mxu1 %v402_v16  ;;  %v386_v24 = vpack.c.bf16 %v33_v22, %v32_v21  ;;  %v143_v26 = vld [vmem:[%s592_s3 + $0x38] sm:$0xff]  ;;  %v34_v27 = vld [vmem:[%s590_s1 + $0x50] sm:$0xff]  ;;  %v144_v31 = vld [vmem:[%s592_s3 + $0x40] sm:$0xff] }
   0x8   :  { %405 = vmatpush3.bf16.msra.mxu1 %v402_v16  ;;  %v35_v28 = vld [vmem:[%s590_s1 + $0x58] sm:$0xff]  ;;  %v414_v29 = vpack.c.bf16 %v143_v26, %v142_v25  ;;  %v145_v32 = vld [vmem:[%s592_s3 + $0x48] sm:$0xff]  ;;  %v36_v33 = vld [vmem:[%s590_s1 + $0x60] sm:$0xff] }
   0x9   :  { %377 = vmatpush3.bf16.msra.mxu0 %v374_v5  ;;  %407 = vmatprep.subr.bf16.mxu1 %v406_v17  ;;  %v390_v30 = vpack.c.bf16 %v35_v28, %v34_v27  ;;  %v37_v34 = vld [vmem:[%s590_s1 + $0x68] sm:$0xff]  ;;  %v418_v35 = vpack.c.bf16 %v145_v32, %v144_v31  ;;  %v146_v37 = vld [vmem:[%s592_s3 + $0x50] sm:$0xff]  ;;  %v147_v38 = vld [vmem:[%s592_s3 + $0x58] sm:$0xff] }
   0xa   :  { %379 = vmatprep.subr.bf16.mxu0 %v378_v8  ;;  %v394_v36 = vpack.c.bf16 %v37_v34, %v36_v33  ;;  %v38_v39 = vld [vmem:[%s590_s1 + $0x70] sm:$0xff]  ;;  %v39_v40 = vld [vmem:[%s590_s1 + $0x78] sm:$0xff]  ;;  %v422_v41 = vpack.c.bf16 %v147_v38, %v146_v37  ;;  %v148_v43 = vld [vmem:[%s592_s3 + $0x60] sm:$0xff] }
   0xb   :  { %v398_v42 = vpack.c.bf16 %v39_v40, %v38_v39  ;;  %v149_v44 = vld [vmem:[%s592_s3 + $0x68] sm:$0xff]  ;;  %v22_v47 = vld [vmem:[%s591_s0 + $0x10] sm:$0xff]  ;;  %v23_v48 = vld [vmem:[%s591_s0 + $0x18] sm:$0xff] }
   0xc   :  { %409 = vmatpush3.bf16.msra.mxu1 %v406_v17  ;;  %v426_v45 = vpack.c.bf16 %v149_v44, %v148_v43  ;;  %v21_v46 = vld [vmem:[%s591_s0 + $0x8] sm:$0xff]  ;;  %v150_v49 = vld [vmem:[%s592_s3 + $0x70] sm:$0xff]  ;;  %v151_v50 = vld [vmem:[%s592_s3 + $0x78] sm:$0xff] }
   0xd   :  { %381 = vmatpush3.bf16.msra.mxu0 %v378_v8  ;;  %411 = vmatprep.subr.bf16.mxu1 %v410_v23  ;;  %v430_v51 = vpack.c.bf16 %v151_v50, %v150_v49  ;;  %v252_v52 = vld [vmem:[%s593_s2] ss:$0 sm:$0xff] }
   0xe   :  { %383 = vmatprep.subr.bf16.mxu0 %v382_v18  ;;  %v253_v1 = vld [vmem:[%s594_s4] ss:$0 sm:$0xff] }
  0x10   :  { %413 = vmatpush3.bf16.msra.mxu1 %v410_v23 }
  0x11   :  { %385 = vmatpush3.bf16.msra.mxu0 %v382_v18  ;;  %415 = vmatprep.subr.bf16.mxu1 %v414_v29 }
  0x12   :  { %387 = vmatprep.subr.bf16.mxu0 %v386_v24 }
  0x14   :  { %417 = vmatpush3.bf16.msra.mxu1 %v414_v29 }
  0x15   :  { %389 = vmatpush3.bf16.msra.mxu0 %v386_v24  ;;  %419 = vmatprep.subr.bf16.mxu1 %v418_v35 }
  0x16   :  { %391 = vmatprep.subr.bf16.mxu0 %v390_v30 }
  0x18   :  { %421 = vmatpush3.bf16.msra.mxu1 %v418_v35 }
  0x19   :  { %393 = vmatpush3.bf16.msra.mxu0 %v390_v30  ;;  %423 = vmatprep.subr.bf16.mxu1 %v422_v41 }
  0x1a   :  { %395 = vmatprep.subr.bf16.mxu0 %v394_v36 }
  0x1c   :  { %425 = vmatpush3.bf16.msra.mxu1 %v422_v41 }
  0x1d   :  { %397 = vmatpush3.bf16.msra.mxu0 %v394_v36  ;;  %427 = vmatprep.subr.bf16.mxu1 %v426_v45 }
  0x1e   :  { %399 = vmatprep.subr.bf16.mxu0 %v398_v42 }
  0x20   :  { %429 = vmatpush3.bf16.msra.mxu1 %v426_v45 }
  0x21   :  { %401 = vmatpush3.bf16.msra.mxu0 %v398_v42  ;;  %431 = vmatprep.subr.bf16.mxu1 %v430_v51 }
  0x24   :  { %327 = vmatmul.mubr.f32.vlgmr.msra.gmra.mrb[0].mxu0 %v21_v46  ;;  %433 = vmatpush3.bf16.msra.mxu1 %v430_v51 }
  0x25   :  { %329 = vmatprep.mubr.f32.mxu0 %v22_v47 }
  0x28   :  { %330 = vmatmul.mubr.f32.gmra.mrb[2].mxu0 %v23_v48 }
  0xf7   :  { %v328_v53 = vpop.f32.mrb[0].mxu0 }
  0xf8   :  { %v119_v54 = vadd.f32 %v328_v53, %v252_v52  ;;  %v113_v55 = vpop.f32.mrb[1].mxu0 }
  0xf9   :  { %v114_v56 = vadd.f32 %v252_v52, %v113_v55 }
  0xfa   :  { %v133_v59 = vmax.f32 %v119_v54, 0.0 }
  0xfb   :  { %v331_v57 = vpop.f32.mrb[2].mxu0  ;;  %v132_v58 = vmax.f32 %v114_v56, 0.0 }
  0xfc   :  { %v129_v60 = vadd.f32 %v331_v57, %v252_v52  ;;  %v123_v61 = vpop.f32.mrb[3].mxu0 }
  0xfd   :  { %v124_v62 = vadd.f32 %v252_v52, %v123_v61  ;;  %364 = vmatprep.mubr.f32.mxu1 %v132_v58 }
  0xfe   :  { %365 = vmatmul.mubr.f32.vlgmr.msra.gmra.mrb[0].mxu1 %v133_v59  ;;  %v135_v0 = vmax.f32 %v129_v60, 0.0 }
  0xff   :  { %v134_v63 = vmax.f32 %v124_v62, 0.0 }
 0x101   :  { %367 = vmatprep.mubr.f32.mxu1 %v134_v63 }
 0x102   :  { %368 = vmatmul.mubr.f32.gmra.mrb[2].mxu1 %v135_v0 }
 0x1d1   :  { %v366_v2 = vpop.f32.mrb[0].mxu1 }
 0x1d2   :  { %v231_v3 = vadd.f32 %v366_v2, %v253_v1  ;;  %v225_v4 = vpop.f32.mrb[1].mxu1 }
 0x1d3   :  { %v226_v5 = vadd.f32 %v253_v1, %v225_v4 }
 0x1d4   :  { %245 = vst [vmem:[%s595_s5 + $0x8] sm:$0xff] %v231_v3 }
 0x1d5   :  { %244 = vst [vmem:[%s595_s5] sm:$0xff] %v226_v5  ;;  %v369_v6 = vpop.f32.mrb[2].mxu1 }
 0x1d6   :  { %v241_v7 = vadd.f32 %v369_v6, %v253_v1  ;;  %v235_v8 = vpop.f32.mrb[3].mxu1 }
 0x1d7   :  { %v236_v9 = vadd.f32 %v253_v1, %v235_v8 }
 0x1d8   :  { %247 = vst [vmem:[%s595_s5 + $0x18] sm:$0xff] %v241_v7 }
 0x1d9   :  { %246 = vst [vmem:[%s595_s5 + $0x10] sm:$0xff] %v236_v9 }

</bundles_post_ra>
